<compile_context>
chip_gen: v5e
topology: v5e:2x2
jax: 0.10.0
libtpu: 0.0.40
codegen_flags: <defaults>
</compile_context>

<pallas_src>
import functools

import numpy as np
import jax
import jax.numpy as jnp
from jax import lax
from jax.experimental import pallas as pl
from jax.experimental.pallas import tpu as pltpu


# ----------------------------------------------------------------------------
# Kernel
# ----------------------------------------------------------------------------
def _basic_block_kernel(x_ref, t1_ref, b1_ref, t2_ref, b2_ref, out_ref, *,
                        rows_per_group):
    """B_blk image-groups per grid step, row-fused lane-packed layout.

    x_ref   : (M, K1)     bf16   M = B_blk*H stacked rows, K1 = P*W*Cin
    t1_ref  : (3, K1, N1) bf16   block-diag banded conv1 weights (BN1 folded)
    b1_ref  : (1, N1)     f32    BN1 bias tiled over P*W
    t2_ref  : (3, N1, N1) bf16   block-diag banded conv2 weights (BN2 folded)
    b2_ref  : (1, N1)     f32    BN2 bias tiled over P*W
    out_ref : (M, N1)     f32
    """
    M = x_ref.shape[0]
    N1 = out_ref.shape[1]
    H = rows_per_group

    # Group-boundary masks (static shapes; computed once per grid step on the
    # VPU).  Row r belongs to image-group r // H; its first/last in-group rows
    # must not receive rolled-in contributions from neighbouring groups
    # (or from the wrap-around of the roll).
    rel = lax.broadcasted_iota(jnp.int32, (M, N1), 0) % H
    not_top = rel != 0            # row is not the first row of its group
    not_bot = rel != (H - 1)      # row is not the last  row of its group

    x = x_ref[...]                # bf16 (M, K1)

    def conv3x3(act_bf16, t_ref):
        # Per-kernel-row matmuls on the UNPADDED rows, then combine vertical
        # taps with sublane rolls:  out[h] = A0[h-1] + A1[h] + A2[h+1],
        # with the halo contributions masked to zero at group boundaries.
        a0 = jnp.dot(act_bf16, t_ref[0], preferred_element_type=jnp.float32)
        a1 = jnp.dot(act_bf16, t_ref[1], preferred_element_type=jnp.float32)
        a2 = jnp.dot(act_bf16, t_ref[2], preferred_element_type=jnp.float32)
        a0s = pltpu.roll(a0, shift=1, axis=0)        # a0s[h] = a0[h-1]
        a2s = pltpu.roll(a2, shift=M - 1, axis=0)    # a2s[h] = a2[h+1]
        return (a1
                + jnp.where(not_top, a0s, 0.0)
                + jnp.where(not_bot, a2s, 0.0))      # f32 (M, N1)

    # conv1 -> BN1(bias) -> ReLU
    h = jnp.maximum(conv3x3(x, t1_ref) + b1_ref[...], 0.0)

    # conv2 -> BN2(bias) -> +residual -> ReLU   (residual/bias math in f32)
    o = conv3x3(h.astype(jnp.bfloat16), t2_ref) + b2_ref[...] \
        + x.astype(jnp.float32)
    out_ref[...] = jnp.maximum(o, 0.0).astype(out_ref.dtype)


# ----------------------------------------------------------------------------
# Host-side weight preparation (once per layer)
# ----------------------------------------------------------------------------
def _banded_conv_weights(w_hwio, width, pack):
    """HWIO (3,3,Cin,Cout) -> (3, pack*width*Cin, pack*width*Cout) banded mats.

    T[ky][wi*Cin+ci, wo*Cout+co] = w[ky, wi-wo+1, ci, co] for |wi-wo| <= 1,
    block-diagonal over `pack` lane-packed images, so
        out_fused_row[h] = sum_ky in_fused_row[h+ky-1] @ T[ky]
    implements a SAME 3x3 conv on the packed row-fused layout (horizontal
    taps + left/right zero padding encoded in the band; packed images never
    interact).
    """
    kh, kw, cin, cout = w_hwio.shape
    w_np = np.asarray(jax.device_get(w_hwio), dtype=np.float32)
    t = np.zeros((kh, width * cin, width * cout), np.float32)
    for ky in range(kh):
        for kx in range(kw):
            dx = kx - 1
            for wo in range(width):
                wi = wo + dx
                if 0 <= wi < width:
                    t[ky, wi * cin:(wi + 1) * cin,
                      wo * cout:(wo + 1) * cout] = w_np[ky, kx]
    tp = np.zeros((kh, pack * width * cin, pack * width * cout), np.float32)
    for p in range(pack):
        tp[:, p * width * cin:(p + 1) * width * cin,
           p * width * cout:(p + 1) * width * cout] = t
    return jnp.asarray(tp)


# ----------------------------------------------------------------------------
# Wrapper
# ----------------------------------------------------------------------------
def basic_block(x_nchw, w1, s1, b1, w2, s2, b2):
    """BasicBlock forward. x_nchw: (N, C, H, W). stride=1, downsample=None."""
    N, Cin, H, W = x_nchw.shape
    Cout = w1.shape[-1]
    if Cin != Cout:
        # TODO(synk): stride>1 / downsample residual path.
        raise NotImplementedError("Only the stride=1, no-downsample "
                                  "BasicBlock is implemented.")

    # --- packing / blocking heuristics --------------------------------------
    # Lane-pack P images so the fused lane width reaches >= 128 (unmasked
    # stores, full MXU tiles); stack B_blk groups per grid step so the matmul
    # M dim amortizes per-step overhead; keep grid length >= 2 when possible
    # so the v7x megacore can split the "parallel" batch axis.
    lane_width = W * Cin
    P = min(max(1, -(-128 // lane_width)), N)
    Np = -(-N // P) * P                       # batch padded to a multiple of P
    G = Np // P                               # number of image groups
    B_blk = 1
    for b in range(1, G + 1):
        if G % b == 0 and b * H <= 256 and (G // b >= 2 or G < 2):
            B_blk = b

    K1 = P * W * Cin
    N1 = P * W * Cout

    # Fold BN scale into conv weights, build block-diag banded weights (bf16).
    t1 = _banded_conv_weights(w1 * s1.reshape(1, 1, 1, -1), W, P).astype(jnp.bfloat16)
    t2 = _banded_conv_weights(w2 * s2.reshape(1, 1, 1, -1), W, P).astype(jnp.bfloat16)
    b1f = jnp.tile(b1.astype(jnp.float32), P * W).reshape(1, N1)
    b2f = jnp.tile(b2.astype(jnp.float32), P * W).reshape(1, N1)

    # Single fused layout change NCHW -> packed row-fused (G*H, P*W*C), bf16.
    xp = x_nchw
    if Np != N:
        xp = jnp.pad(xp, ((0, Np - N), (0, 0), (0, 0), (0, 0)))
    xf = (jnp.transpose(xp.reshape(G, P, Cin, H, W), (0, 3, 1, 4, 2))
          .reshape(G * H, K1).astype(jnp.bfloat16))

    kernel = functools.partial(_basic_block_kernel, rows_per_group=H)
    out_f = pl.pallas_call(
        kernel,
        out_shape=jax.ShapeDtypeStruct((G * H, N1), jnp.float32),
        grid=(G // B_blk,),
        in_specs=[
            pl.BlockSpec((B_blk * H, K1), lambda g: (g, 0)),
            pl.BlockSpec((3, K1, N1), lambda g: (0, 0, 0)),
            pl.BlockSpec((1, N1), lambda g: (0, 0)),
            pl.BlockSpec((3, N1, N1), lambda g: (0, 0, 0)),
            pl.BlockSpec((1, N1), lambda g: (0, 0)),
        ],
        out_specs=pl.BlockSpec((B_blk * H, N1), lambda g: (g, 0)),
        compiler_params=pltpu.CompilerParams(
            dimension_semantics=("parallel",),      # batch axis over both TCs
            vmem_limit_bytes=32 * 1024 * 1024),     # fits v7x 64MiB budget too
    )(xf, t1, b1f, t2, b2f)

    # Single fused layout change back: packed row-fused -> NCHW.
    out = jnp.transpose(out_f.reshape(G, H, P, W, Cout), (0, 2, 4, 1, 3))
    out = out.reshape(Np, Cout, H, W)
    return out[:N] if Np != N else out


# ----------------------------------------------------------------------------
# Pure-JAX reference & test harness
# ----------------------------------------------------------------------------
def reference_block(x_nchw, w1, s1, b1, w2, s2, b2):
    x = jnp.transpose(x_nchw, (0, 2, 3, 1)).astype(jnp.float32)
    dn = ('NHWC', 'HWIO', 'NHWC')
    c1 = lax.conv_general_dilated(x, w1, (1, 1), 'SAME', dimension_numbers=dn,
                                  precision=lax.Precision.HIGHEST)
    h = jnp.maximum(c1 * s1.reshape(1, 1, 1, -1) + b1.reshape(1, 1, 1, -1), 0.0)
    c2 = lax.conv_general_dilated(h, w2, (1, 1), 'SAME', dimension_numbers=dn,
                                  precision=lax.Precision.HIGHEST)
    o = c2 * s2.reshape(1, 1, 1, -1) + b2.reshape(1, 1, 1, -1) + x
    o = jnp.maximum(o, 0.0)
    return jnp.transpose(o, (0, 3, 1, 2))


def make_params(key, cin, cout, eps=1e-5):
    """Deterministic synthetic weights + folded inference-mode BatchNorm."""
    ks = jax.random.split(key, 8)
    w1 = jax.random.normal(ks[0], (3, 3, cin, cout), jnp.float32) * 0.1
    w2 = jax.random.normal(ks[1], (3, 3, cout, cout), jnp.float32) * 0.1
    g1 = 1.0 + 0.1 * jax.random.normal(ks[2], (cout,), jnp.float32)
    be1 = 0.1 * jax.random.normal(ks[3], (cout,), jnp.float32)
    m1 = 0.1 * jax.random.normal(ks[4], (cout,), jnp.float32)
    v1 = jnp.abs(jax.random.normal(ks[5], (cout,), jnp.float32)) + 0.5
    g2 = 1.0 + 0.1 * jax.random.normal(ks[6], (cout,), jnp.float32)
    be2 = 0.1 * jax.random.normal(ks[7], (cout,), jnp.float32)
    m2 = jnp.zeros((cout,), jnp.float32)
    v2 = jnp.ones((cout,), jnp.float32)
    s1 = g1 / jnp.sqrt(v1 + eps)
    b1 = be1 - m1 * s1
    s2 = g2 / jnp.sqrt(v2 + eps)
    b2 = be2 - m2 * s2
    return w1, s1, b1, w2, s2, b2


if __name__ == "__main__":
    key = jax.random.PRNGKey(0)
    kx, kp, kx2 = jax.random.split(key, 3)

    # Spec-sized case: inplanes == planes == 4, stride=1, spatial 16x16.
    N, C, H, W = 2, 4, 16, 16
    x = jax.random.normal(kx, (N, C, H, W), jnp.float32)
    w1, s1, b1, w2, s2, b2 = make_params(kp, C, C)

    out = jax.block_until_ready(basic_block(x, w1, s1, b1, w2, s2, b2))
    ref = reference_block(x, w1, s1, b1, w2, s2, b2)
    assert out.shape == (N, C, H, W)
    # bf16 MXU inputs / bf16 residual source with f32 accumulation.
    assert jnp.allclose(out, ref, atol=5e-2, rtol=5e-2), \
        float(jnp.max(jnp.abs(out - ref)))

    # Larger batch: exercises multi-group grid steps (B_blk>1) and the
    # group-boundary masking of the rolled vertical taps.
    N2 = 8
    x2 = jax.random.normal(kx2, (N2, C, H, W), jnp.float32)
    out2 = jax.block_until_ready(basic_block(x2, w1, s1, b1, w2, s2, b2))
    ref2 = reference_block(x2, w1, s1, b1, w2, s2, b2)
    assert out2.shape == (N2, C, H, W)
    assert jnp.allclose(out2, ref2, atol=5e-2, rtol=5e-2), \
        float(jnp.max(jnp.abs(out2 - ref2)))

    print("KERNEL_OK")
</pallas_src>

<mosaic_0001>
module attributes {stable_mosaic.version = 11 : i64} {
  func.func @_basic_block_kernel(%arg0: i32, %arg1: memref<16x128xbf16, #tpu.memory_space<vmem>>, %arg2: memref<3x128x128xbf16, #tpu.memory_space<vmem>>, %arg3: memref<1x128xf32, #tpu.memory_space<vmem>>, %arg4: memref<3x128x128xbf16, #tpu.memory_space<vmem>>, %arg5: memref<1x128xf32, #tpu.memory_space<vmem>>, %arg6: memref<16x128xf32, #tpu.memory_space<vmem>>) attributes {dimension_semantics = [#tpu.dimension_semantics<parallel>], iteration_bounds = array<i64: 1>, scalar_prefetch = 0 : i64, scratch_operands = 0 : i64, tpu.core_type = #tpu.core_type<tc>, window_params = [{transform_indices = @transform_0, window_bounds = array<i64: 16, 128>}, {pipeline_mode = #tpu.pipeline_mode<synchronous>, transform_indices = @transform_1, window_bounds = array<i64: 3, 128, 128>}, {pipeline_mode = #tpu.pipeline_mode<synchronous>, transform_indices = @transform_2, window_bounds = array<i64: 1, 128>}, {pipeline_mode = #tpu.pipeline_mode<synchronous>, transform_indices = @transform_3, window_bounds = array<i64: 3, 128, 128>}, {pipeline_mode = #tpu.pipeline_mode<synchronous>, transform_indices = @transform_4, window_bounds = array<i64: 1, 128>}, {transform_indices = @transform_5, window_bounds = array<i64: 16, 128>}]} {
    %0 = tpu.iota {dimensions = array<i32: 0>} : vector<16x128xi32>
    %c16_i32 = arith.constant 16 : i32
    %c0_i32 = arith.constant 0 : i32
    %1 = arith.cmpi eq, %c16_i32, %c0_i32 : i32
    %c1_i32 = arith.constant 1 : i32
    %2 = arith.select %1, %c1_i32, %c16_i32 : i32
    %3 = vector.broadcast %2 : i32 to vector<16x128xi32>
    %4 = arith.remsi %0, %3 : vector<16x128xi32>
    %c0_i32_0 = arith.constant 0 : i32
    %5 = vector.broadcast %c0_i32_0 : i32 to vector<16x128xi32>
    %6 = arith.cmpi ne, %4, %5 : vector<16x128xi32>
    %c0_i32_1 = arith.constant 0 : i32
    %7 = vector.broadcast %c0_i32_1 : i32 to vector<16x128xi32>
    %8 = arith.cmpi slt, %4, %7 : vector<16x128xi32>
    %c0_i32_2 = arith.constant 0 : i32
    %9 = arith.cmpi slt, %2, %c0_i32_2 : i32
    %10 = vector.broadcast %9 : i1 to vector<16x128xi1>
    %11 = vector.broadcast %10 : vector<16x128xi1> to vector<16x128xi1>
    %12 = arith.xori %8, %11 : vector<16x128xi1>
    %13 = arith.andi %12, %6 : vector<16x128xi1>
    %14 = vector.broadcast %2 : i32 to vector<16x128xi32>
    %15 = arith.addi %4, %14 : vector<16x128xi32>
    %16 = arith.select %13, %15, %4 : vector<16x128xi1>, vector<16x128xi32>
    %c0_i32_3 = arith.constant 0 : i32
    %17 = vector.broadcast %c0_i32_3 : i32 to vector<16x128xi32>
    %18 = arith.cmpi ne, %16, %17 : vector<16x128xi32>
    %c15_i32 = arith.constant 15 : i32
    %19 = vector.broadcast %c15_i32 : i32 to vector<16x128xi32>
    %20 = arith.cmpi ne, %16, %19 : vector<16x128xi32>
    %c0 = arith.constant 0 : index
    %c0_4 = arith.constant 0 : index
    %21 = vector.load %arg1[%c0, %c0_4] : memref<16x128xbf16, #tpu.memory_space<vmem>>, vector<16x128xbf16>
    %c0_5 = arith.constant 0 : index
    %c0_6 = arith.constant 0 : index
    %c0_7 = arith.constant 0 : index
    %22 = vector.load %arg2[%c0_5, %c0_6, %c0_7] : memref<3x128x128xbf16, #tpu.memory_space<vmem>>, vector<1x128x128xbf16>
    %23 = vector.shape_cast %22 : vector<1x128x128xbf16> to vector<128x128xbf16>
    %cst = arith.constant dense<0.000000e+00> : vector<16x128xf32>
    %24 = tpu.matmul %21, %23, %cst {dimension_numbers = #tpu.dot_dimension_numbers<[1], [0], [0], [1], [0, 0, 1, 1], [], []>} : vector<16x128xbf16>, vector<128x128xbf16>, vector<16x128xf32> -> vector<16x128xf32>
    %c1 = arith.constant 1 : index
    %c0_8 = arith.constant 0 : index
    %c0_9 = arith.constant 0 : index
    %25 = vector.load %arg2[%c1, %c0_8, %c0_9] : memref<3x128x128xbf16, #tpu.memory_space<vmem>>, vector<1x128x128xbf16>
    %26 = vector.shape_cast %25 : vector<1x128x128xbf16> to vector<128x128xbf16>
    %cst_10 = arith.constant dense<0.000000e+00> : vector<16x128xf32>
    %27 = tpu.matmul %21, %26, %cst_10 {dimension_numbers = #tpu.dot_dimension_numbers<[1], [0], [0], [1], [0, 0, 1, 1], [], []>} : vector<16x128xbf16>, vector<128x128xbf16>, vector<16x128xf32> -> vector<16x128xf32>
    %c2 = arith.constant 2 : index
    %c0_11 = arith.constant 0 : index
    %c0_12 = arith.constant 0 : index
    %28 = vector.load %arg2[%c2, %c0_11, %c0_12] : memref<3x128x128xbf16, #tpu.memory_space<vmem>>, vector<1x128x128xbf16>
    %29 = vector.shape_cast %28 : vector<1x128x128xbf16> to vector<128x128xbf16>
    %cst_13 = arith.constant dense<0.000000e+00> : vector<16x128xf32>
    %30 = tpu.matmul %21, %29, %cst_13 {dimension_numbers = #tpu.dot_dimension_numbers<[1], [0], [0], [1], [0, 0, 1, 1], [], []>} : vector<16x128xbf16>, vector<128x128xbf16>, vector<16x128xf32> -> vector<16x128xf32>
    %c1_i32_14 = arith.constant 1 : i32
    %31 = tpu.dynamic_rotate %24 by %c1_i32_14 dim 0 : vector<16x128xf32>, i32 -> vector<16x128xf32>
    %c15_i32_15 = arith.constant 15 : i32
    %32 = tpu.dynamic_rotate %30 by %c15_i32_15 dim 0 : vector<16x128xf32>, i32 -> vector<16x128xf32>
    %cst_16 = arith.constant 0.000000e+00 : f32
    %33 = vector.broadcast %cst_16 : f32 to vector<16x128xf32>
    %34 = arith.select %18, %31, %33 : vector<16x128xi1>, vector<16x128xf32>
    %35 = arith.addf %27, %34 : vector<16x128xf32>
    %cst_17 = arith.constant 0.000000e+00 : f32
    %36 = vector.broadcast %cst_17 : f32 to vector<16x128xf32>
    %37 = arith.select %20, %32, %36 : vector<16x128xi1>, vector<16x128xf32>
    %38 = arith.addf %35, %37 : vector<16x128xf32>
    %c0_18 = arith.constant 0 : index
    %c0_19 = arith.constant 0 : index
    %39 = vector.load %arg3[%c0_18, %c0_19] : memref<1x128xf32, #tpu.memory_space<vmem>>, vector<1x128xf32>
    %40 = vector.broadcast %39 : vector<1x128xf32> to vector<16x128xf32>
    %41 = arith.addf %38, %40 : vector<16x128xf32>
    %cst_20 = arith.constant 0.000000e+00 : f32
    %42 = vector.broadcast %cst_20 : f32 to vector<16x128xf32>
    %43 = arith.maximumf %41, %42 : vector<16x128xf32>
    %44 = arith.truncf %43 : vector<16x128xf32> to vector<16x128xbf16>
    %c0_21 = arith.constant 0 : index
    %c0_22 = arith.constant 0 : index
    %c0_23 = arith.constant 0 : index
    %45 = vector.load %arg4[%c0_21, %c0_22, %c0_23] : memref<3x128x128xbf16, #tpu.memory_space<vmem>>, vector<1x128x128xbf16>
    %46 = vector.shape_cast %45 : vector<1x128x128xbf16> to vector<128x128xbf16>
    %cst_24 = arith.constant dense<0.000000e+00> : vector<16x128xf32>
    %47 = tpu.matmul %44, %46, %cst_24 {dimension_numbers = #tpu.dot_dimension_numbers<[1], [0], [0], [1], [0, 0, 1, 1], [], []>} : vector<16x128xbf16>, vector<128x128xbf16>, vector<16x128xf32> -> vector<16x128xf32>
    %c1_25 = arith.constant 1 : index
    %c0_26 = arith.constant 0 : index
    %c0_27 = arith.constant 0 : index
    %48 = vector.load %arg4[%c1_25, %c0_26, %c0_27] : memref<3x128x128xbf16, #tpu.memory_space<vmem>>, vector<1x128x128xbf16>
    %49 = vector.shape_cast %48 : vector<1x128x128xbf16> to vector<128x128xbf16>
    %cst_28 = arith.constant dense<0.000000e+00> : vector<16x128xf32>
    %50 = tpu.matmul %44, %49, %cst_28 {dimension_numbers = #tpu.dot_dimension_numbers<[1], [0], [0], [1], [0, 0, 1, 1], [], []>} : vector<16x128xbf16>, vector<128x128xbf16>, vector<16x128xf32> -> vector<16x128xf32>
    %c2_29 = arith.constant 2 : index
    %c0_30 = arith.constant 0 : index
    %c0_31 = arith.constant 0 : index
    %51 = vector.load %arg4[%c2_29, %c0_30, %c0_31] : memref<3x128x128xbf16, #tpu.memory_space<vmem>>, vector<1x128x128xbf16>
    %52 = vector.shape_cast %51 : vector<1x128x128xbf16> to vector<128x128xbf16>
    %cst_32 = arith.constant dense<0.000000e+00> : vector<16x128xf32>
    %53 = tpu.matmul %44, %52, %cst_32 {dimension_numbers = #tpu.dot_dimension_numbers<[1], [0], [0], [1], [0, 0, 1, 1], [], []>} : vector<16x128xbf16>, vector<128x128xbf16>, vector<16x128xf32> -> vector<16x128xf32>
    %c1_i32_33 = arith.constant 1 : i32
    %54 = tpu.dynamic_rotate %47 by %c1_i32_33 dim 0 : vector<16x128xf32>, i32 -> vector<16x128xf32>
    %c15_i32_34 = arith.constant 15 : i32
    %55 = tpu.dynamic_rotate %53 by %c15_i32_34 dim 0 : vector<16x128xf32>, i32 -> vector<16x128xf32>
    %cst_35 = arith.constant 0.000000e+00 : f32
    %56 = vector.broadcast %cst_35 : f32 to vector<16x128xf32>
    %57 = arith.select %18, %54, %56 : vector<16x128xi1>, vector<16x128xf32>
    %58 = arith.addf %50, %57 : vector<16x128xf32>
    %cst_36 = arith.constant 0.000000e+00 : f32
    %59 = vector.broadcast %cst_36 : f32 to vector<16x128xf32>
    %60 = arith.select %20, %55, %59 : vector<16x128xi1>, vector<16x128xf32>
    %61 = arith.addf %58, %60 : vector<16x128xf32>
    %c0_37 = arith.constant 0 : index
    %c0_38 = arith.constant 0 : index
    %62 = vector.load %arg5[%c0_37, %c0_38] : memref<1x128xf32, #tpu.memory_space<vmem>>, vector<1x128xf32>
    %63 = vector.broadcast %62 : vector<1x128xf32> to vector<16x128xf32>
    %64 = arith.addf %61, %63 : vector<16x128xf32>
    %65 = arith.extf %21 : vector<16x128xbf16> to vector<16x128xf32>
    %66 = arith.addf %64, %65 : vector<16x128xf32>
    %cst_39 = arith.constant 0.000000e+00 : f32
    %67 = vector.broadcast %cst_39 : f32 to vector<16x128xf32>
    %68 = arith.maximumf %66, %67 : vector<16x128xf32>
    %c0_40 = arith.constant 0 : index
    %c0_41 = arith.constant 0 : index
    %69 = vector.load %arg6[%c0_40, %c0_41] : memref<16x128xf32, #tpu.memory_space<vmem>>, vector<16x128xf32>
    tpu.vector_store %arg6[%c0_40, %c0_41], %68 {strides = array<i32>} : memref<16x128xf32, #tpu.memory_space<vmem>>, vector<16x128xf32>,
    return
  }
  func.func @transform_0(%arg0: i32) -> (i32, i32) {
    %c0_i32 = arith.constant 0 : i32
    %c0_i32_0 = arith.constant 0 : i32
    return %arg0, %c0_i32 : i32, i32
  }
  func.func @transform_1(%arg0: i32) -> (i32, i32, i32) {
    %c0_i32 = arith.constant 0 : i32
    %c0_i32_0 = arith.constant 0 : i32
    %c0_i32_1 = arith.constant 0 : i32
    %c0_i32_2 = arith.constant 0 : i32
    return %c0_i32, %c0_i32_0, %c0_i32_1 : i32, i32, i32
  }
  func.func @transform_2(%arg0: i32) -> (i32, i32) {
    %c0_i32 = arith.constant 0 : i32
    %c0_i32_0 = arith.constant 0 : i32
    %c0_i32_1 = arith.constant 0 : i32
    return %c0_i32, %c0_i32_0 : i32, i32
  }
  func.func @transform_3(%arg0: i32) -> (i32, i32, i32) {
    %c0_i32 = arith.constant 0 : i32
    %c0_i32_0 = arith.constant 0 : i32
    %c0_i32_1 = arith.constant 0 : i32
    %c0_i32_2 = arith.constant 0 : i32
    return %c0_i32, %c0_i32_0, %c0_i32_1 : i32, i32, i32
  }
  func.func @transform_4(%arg0: i32) -> (i32, i32) {
    %c0_i32 = arith.constant 0 : i32
    %c0_i32_0 = arith.constant 0 : i32
    %c0_i32_1 = arith.constant 0 : i32
    return %c0_i32, %c0_i32_0 : i32, i32
  }
  func.func @transform_5(%arg0: i32) -> (i32, i32) {
    %c0_i32 = arith.constant 0 : i32
    %c0_i32_0 = arith.constant 0 : i32
    return %arg0, %c0_i32 : i32, i32
  }
}

</mosaic_0001>

<bundles_post_ra>
// kernel: tpu_custom_call.1
= control target key start
LH: loop header
LB: loop body
LE: loop exit
PB: predicated region body
PF: predicated region fallthrough
CT: control target
= control target key end

     0   :  { %10 = vsyncpa [#allocation3], 0  ;;  %s1089_s0 = inlined_call_operand.hbm [shape: bf16[16,128], index: 0, kind: input, shape index: {}]   ;;  %s1090_s1 = inlined_call_operand.hbm [shape: bf16[3,128,128], index: 1, kind: input, shape index: {}]   ;;  %s1091_s2 = inlined_call_operand.vmem [shape: f32[1,128], index: 2, kind: input, shape index: {}]   ;;  %s1092_s3 = inlined_call_operand.hbm [shape: bf16[3,128,128], index: 3, kind: input, shape index: {}]   ;;  %s1093_s4 = inlined_call_operand.vmem [shape: f32[1,128], index: 4, kind: input, shape index: {}]   ;;  %s1094_s5 = inlined_call_operand.hbm [shape: f32[16,128], index: 5, kind: output, shape index: {}]  }
   0x1   :  { %11 = vsyncpa [#allocation6], 0 }
   0x2   :  { %12 = vsyncpa [#allocation4], 0  ;;  %s30_s20 = sshll.u32 %s1090_s1, 4  ;;  %s1009_s21 = smov [#allocation5]   ;;  %s31_s20 = int_to_ptr.hbm [resolvable:$true] %s30_s20 }
   0x3   :  { %s32_s22 = sshll.u32 %s1009_s21, 4  ;;  %s17_s25 = sshll.u32 %s1089_s0, 4  ;;  %s33_s22 = int_to_ptr.vmem [resolvable:$true] %s32_s22  ;;  %s18_s25 = int_to_ptr.hbm [resolvable:$true] %s17_s25 }
   0x4   :  { %s1010_s26 = smov 64   ;;  %s1011_s27 = smov 4  }
   0x5   :  { %38 = dma.hbm_to_vmem [thread:$0]  %s31_s20, 3072, %s33_s22, [#allocation6], %s1010_s26, %s1010_s26, %s1011_s27  }
   0x6   :  { %s1012_s28 = smov [#allocation2]   ;;  %s45_s7 = sshll.u32 %s1092_s3, 4  ;;  %s46_s7 = int_to_ptr.hbm [resolvable:$true] %s45_s7 }
   0x7   :  { %s19_s29 = sshll.u32 %s1012_s28, 4  ;;  %s1013_s1 = smov [#allocation7]   ;;  %s20_s29 = int_to_ptr.vmem [resolvable:$true] %s19_s29 }
   0x8   :  { %25 = dma.hbm_to_vmem [thread:$0]  %s18_s25, 128, %s20_s29, [#allocation3], %s1010_s26, %s1010_s26, %s1011_s27  }
   0x9   :  { %s47_s8 = sshll.u32 %s1013_s1, 4  ;;  %s48_s8 = int_to_ptr.vmem [resolvable:$true] %s47_s8 }
   0xa   :  { %53 = dma.hbm_to_vmem [thread:$0]  %s46_s7, 3072, %s48_s8, [#allocation6], %s1010_s26, %s1010_s26, %s1011_s27  }
   0xb   :  { %1003 = dma.done.wait [#allocation3], 128  }
   0xc   :  { %1004 = vsyncadd [#allocation3], 4294967168 }
   0xd   :  { %1005 = dma.done.wait [#allocation6], 6144  }
   0xe   :  { %1006 = vsyncadd [#allocation6], 4294961152  ;;  %v856_v0 = vld [vmem:[#allocation5 + $0x38] sm:$0xff]  ;;  %v855_v3 = vld [vmem:[#allocation5 + $0x30] sm:$0xff]  ;;  %v68_v49 = vlaneseq  ;;  %s1014_s10 = smov [#allocation8]   ;;  %s638_s14 = sshll.u32 %s1094_s5, 4  ;;  %s639_s14 = int_to_ptr.hbm [resolvable:$true] %s638_s14 }
   0xf   :  { %v872_v1 = vld [vmem:[#allocation5 + $0xb8] sm:$0xff]  ;;  %171 = vmatpush.bf16.msra.mxu0 %v856_v0  ;;  %v871_v4 = vld [vmem:[#allocation5 + $0xb0] sm:$0xff]  ;;  %v854_v6 = vld [vmem:[#allocation5 + $0x28] sm:$0xff]  ;;  %s636_s11 = sshll.u32 %s1014_s10, 4  ;;  %s1016_s15 = smov 8   ;;  %s637_s11 = int_to_ptr.vmem [resolvable:$true] %s636_s11 }
  0x10   :  { %v864_v2 = vld [vmem:[#allocation5 + $0x78] sm:$0xff]  ;;  %267 = vmatpush.bf16.msra.mxu1 %v872_v1  ;;  %v863_v5 = vld [vmem:[#allocation5 + $0x70] sm:$0xff]  ;;  %v870_v7 = vld [vmem:[#allocation5 + $0xa8] sm:$0xff]  ;;  %v69_v52 = vshrl.u32 %v68_v49, 7 }
  0x11   :  { %341 = vmatpush.bf16.msra.mxu2 %v864_v2  ;;  %v862_v8 = vld [vmem:[#allocation5 + $0x68] sm:$0xff]  ;;  %v880_v9 = vld [vmem:[#allocation7 + $0x38] sm:$0xff]  ;;  %v853_v10 = vld [vmem:[#allocation5 + $0x20] sm:$0xff] }
  0x12   :  { %v869_v11 = vld [vmem:[#allocation5 + $0xa0] sm:$0xff]  ;;  %432 = vmatpush.bf16.msra.mxu3 %v880_v9  ;;  %v879_v13 = vld [vmem:[#allocation7 + $0x30] sm:$0xff]  ;;  %v852_v14 = vld [vmem:[#allocation5 + $0x18] sm:$0xff]  ;;  %v75_v53 = vand.u32 15, %v69_v52  ;;  %v70_v54 = vadd.s32 8, %v69_v52  ;;  %vm283_vm0 = vcmp.lt.s32.totalorder %v69_v52, 1 }
  0x13   :  { %172 = vmatpush.bf16.msra.mxu0 %v855_v3  ;;  %v861_v12 = vld [vmem:[#allocation5 + $0x60] sm:$0xff]  ;;  %v868_v15 = vld [vmem:[#allocation5 + $0x98] sm:$0xff]  ;;  %v851_v17 = vld [vmem:[#allocation5 + $0x10] sm:$0xff]  ;;  %vm288_vm2 = vcmp.lt.s32.totalorder %v69_v52, 7 }
  0x14   :  { %268 = vmatpush.bf16.msra.mxu1 %v871_v4  ;;  %v860_v16 = vld [vmem:[#allocation5 + $0x58] sm:$0xff]  ;;  %v867_v18 = vld [vmem:[#allocation5 + $0x90] sm:$0xff]  ;;  %v850_v20 = vld [vmem:[#allocation5 + $0x8] sm:$0xff]  ;;  %vm1056_vm1 = vcmp.ne.s32.totalorder %v75_v53, 0  ;;  %v82_v62 = vand.u32 15, %v70_v54 }
  0x15   :  { %342 = vmatpush.bf16.msra.mxu2 %v863_v5  ;;  %v859_v19 = vld [vmem:[#allocation5 + $0x50] sm:$0xff]  ;;  %v866_v21 = vld [vmem:[#allocation5 + $0x88] sm:$0xff]  ;;  %v849_v23 = vld [vmem:[#allocation5] sm:$0xff] }
  0x16   :  { %433 = vmatpush.bf16.msra.mxu3 %v879_v13  ;;  %v858_v22 = vld [vmem:[#allocation5 + $0x48] sm:$0xff]  ;;  %v865_v24 = vld [vmem:[#allocation5 + $0x80] sm:$0xff]  ;;  %v896_v26 = vld [vmem:[#allocation7 + $0xb8] sm:$0xff]  ;;  %vm1064_vm3 = vcmp.ne.s32.totalorder %v82_v62, 15 }
  0x17   :  { %173 = vmatpush.bf16.msra.mxu0 %v854_v6  ;;  %v857_v25 = vld [vmem:[#allocation5 + $0x40] sm:$0xff]  ;;  %v888_v27 = vld [vmem:[#allocation7 + $0x78] sm:$0xff]  ;;  %v895_v29 = vld [vmem:[#allocation7 + $0xb0] sm:$0xff] }
  0x18   :  { %269 = vmatpush.bf16.msra.mxu1 %v870_v7  ;;  %v848_v28 = vld [vmem:[#allocation2] sm:$0xff]  ;;  %v887_v30 = vld [vmem:[#allocation7 + $0x70] sm:$0xff]  ;;  %v878_v31 = vld [vmem:[#allocation7 + $0x28] sm:$0xff] }
  0x19   :  { %343 = vmatpush.bf16.msra.mxu2 %v862_v8  ;;  %v894_v32 = vld [vmem:[#allocation7 + $0xa8] sm:$0xff]  ;;  %v877_v34 = vld [vmem:[#allocation7 + $0x20] sm:$0xff]  ;;  %v876_v37 = vld [vmem:[#allocation7 + $0x18] sm:$0xff] }
  0x1a   :  { %v886_v33 = vld [vmem:[#allocation7 + $0x68] sm:$0xff]  ;;  %434 = vmatpush.bf16.msra.mxu3 %v878_v31  ;;  %v893_v35 = vld [vmem:[#allocation7 + $0xa0] sm:$0xff]  ;;  %v892_v38 = vld [vmem:[#allocation7 + $0x98] sm:$0xff] }
  0x1b   :  { %174 = vmatpush.bf16.msra.mxu0 %v853_v10  ;;  %v885_v36 = vld [vmem:[#allocation7 + $0x60] sm:$0xff]  ;;  %v884_v39 = vld [vmem:[#allocation7 + $0x58] sm:$0xff]  ;;  %v875_v40 = vld [vmem:[#allocation7 + $0x10] sm:$0xff] }
  0x1c   :  { %270 = vmatpush.bf16.msra.mxu1 %v869_v11  ;;  %v891_v41 = vld [vmem:[#allocation7 + $0x90] sm:$0xff]  ;;  %v874_v43 = vld [vmem:[#allocation7 + $0x8] sm:$0xff]  ;;  %v873_v46 = vld [vmem:[#allocation7] sm:$0xff] }
  0x1d   :  { %344 = vmatpush.bf16.msra.mxu2 %v861_v12  ;;  %v883_v42 = vld [vmem:[#allocation7 + $0x50] sm:$0xff]  ;;  %v890_v44 = vld [vmem:[#allocation7 + $0x88] sm:$0xff]  ;;  %v889_v47 = vld [vmem:[#allocation7 + $0x80] sm:$0xff] }
  0x1e   :  { %435 = vmatpush.bf16.msra.mxu3 %v877_v34  ;;  %v882_v45 = vld [vmem:[#allocation7 + $0x48] sm:$0xff]  ;;  %v881_v48 = vld [vmem:[#allocation7 + $0x40] sm:$0xff]  ;;  %v905_v6 = vld [vmem:[%s1091_s2] ss:$0 sm:$0xff] }
  0x1f   :  { %175 = vmatpush.bf16.msra.mxu0 %v852_v14  ;;  %v906_v34 = vld [vmem:[%s1093_s4] ss:$0 sm:$0xff]  ;;  %s1015_s4 = smov 128  }
  0x20   :  { %271 = vmatpush.bf16.msra.mxu1 %v868_v15 }
  0x21   :  { %345 = vmatpush.bf16.msra.mxu2 %v860_v16 }
  0x22   :  { %436 = vmatpush.bf16.msra.mxu3 %v876_v37 }
  0x23   :  { %176 = vmatpush.bf16.msra.mxu0 %v851_v17 }
  0x24   :  { %272 = vmatpush.bf16.msra.mxu1 %v867_v18 }
  0x25   :  { %346 = vmatpush.bf16.msra.mxu2 %v859_v19 }
  0x26   :  { %437 = vmatpush.bf16.msra.mxu3 %v875_v40 }
  0x27   :  { %177 = vmatpush.bf16.msra.mxu0 %v850_v20 }
  0x28   :  { %273 = vmatpush.bf16.msra.mxu1 %v866_v21 }
  0x29   :  { %347 = vmatpush.bf16.msra.mxu2 %v858_v22 }
  0x2a   :  { %438 = vmatpush.bf16.msra.mxu3 %v874_v43 }
  0x2b   :  { %178 = vmatpush.bf16.msra.mxu0 %v849_v23 }
  0x2c   :  { %274 = vmatpush.bf16.msra.mxu1 %v865_v24 }
  0x2d   :  { %348 = vmatpush.bf16.msra.mxu2 %v857_v25 }
  0x2e   :  { %179 = vmatmul.bf16.vlgmr.msra.gmra.mxu0 %v848_v28  ;;  %439 = vmatpush.bf16.msra.mxu3 %v873_v46 }
  0x2f   :  { %528 = vmatpush.bf16.msrb.mxu0 %v896_v26  ;;  %275 = vmatmul.bf16.vlgmr.msra.gmra.mxu1 %v848_v28 }
  0x30   :  { %600 = vmatpush.bf16.msrb.mxu1 %v888_v27  ;;  %349 = vmatmul.bf16.vlgmr.msra.gmra.mxu2 %v848_v28 }
  0x33   :  { %529 = vmatpush.bf16.msrb.mxu0 %v895_v29  ;;  %v99_v29 = vld [vmem:[#allocation2] sm:$0xff]  }
  0x34   :  { %601 = vmatpush.bf16.msrb.mxu1 %v887_v30 }
  0x37   :  { %530 = vmatpush.bf16.msrb.mxu0 %v894_v32 }
  0x38   :  { %602 = vmatpush.bf16.msrb.mxu1 %v886_v33 }
  0x3b   :  { %531 = vmatpush.bf16.msrb.mxu0 %v893_v35 }
  0x3c   :  { %603 = vmatpush.bf16.msrb.mxu1 %v885_v36 }
  0x3f   :  { %532 = vmatpush.bf16.msrb.mxu0 %v892_v38 }
  0x40   :  { %604 = vmatpush.bf16.msrb.mxu1 %v884_v39  ;;  %v625_v39 = vunpack.c.h.bf16 %v99_v29 }
  0x43   :  { %533 = vmatpush.bf16.msrb.mxu0 %v891_v41  ;;  %v624_v41 = vunpack.c.l.bf16 %v99_v29 }
  0x44   :  { %605 = vmatpush.bf16.msrb.mxu1 %v883_v42 }
  0x47   :  { %534 = vmatpush.bf16.msrb.mxu0 %v890_v44 }
  0x48   :  { %606 = vmatpush.bf16.msrb.mxu1 %v882_v45 }
  0x4b   :  { %535 = vmatpush.bf16.msrb.mxu0 %v889_v47 }
  0x4c   :  { %607 = vmatpush.bf16.msrb.mxu1 %v881_v48 }
  0xab   :  { %v180_v50 = vpop.f32.mrf.mxu0 }
  0xac   :  { %v276_v51 = vpop.f32.mrf.mxu1  ;;  %v281_v58 = vrot.slane %v180_v50, 7 }
  0xad   :  { %v286_v0 = vrot.slane %v276_v51, 1 }
  0xb3   :  { %v350_v55 = vpop.f32.mrf.mxu2  ;;  %v182_v56 = vpop.f32.mrf.mxu0 }
  0xb4   :  { %v278_v57 = vpop.f32.mrf.mxu1  ;;  %v282_v60 = vrot.slane %v182_v56, 7 }
  0xb5   :  { %v287_v61 = vrot.slane %v278_v57, 1 }
  0xb6   :  { %v285_v63 = vsel %vm283_vm0, %v282_v60, %v281_v58  ;;  %v284_v8 = vsel %vm283_vm0, %v281_v58, %v282_v60 }
  0xb7   :  { %v291_v1 = vsel %vm1056_vm1, %v285_v63, 0.0  ;;  %v289_v3 = vsel %vm288_vm2, %v286_v0, %v287_v61  ;;  %v290_v5 = vsel %vm288_vm2, %v287_v61, %v286_v0 }
  0xb8   :  { %v351_v2 = vadd.f32 %v350_v55, %v291_v1  ;;  %v356_v11 = vsel %vm1064_vm3, %v290_v5, 0.0 }
  0xba   :  { %v357_v7 = vadd.f32 %v351_v2, %v289_v3 }
  0xbb   :  { %v352_v9 = vpop.f32.mrf.mxu2 }
  0xbc   :  { %v353_v10 = vadd.f32 %v352_v9, %v284_v8  ;;  %v363_v13 = vadd.f32 %v905_v6, %v357_v7 }
  0xbe   :  { %v358_v12 = vadd.f32 %v356_v11, %v353_v10  ;;  %v365_v16 = vmax.f32 %v363_v13, 0.0 }
  0xc0   :  { %v364_v14 = vadd.f32 %v905_v6, %v358_v12 }
  0xc2   :  { %v366_v15 = vmax.f32 %v364_v14, 0.0 }
  0xc4   :  { %v367_v17 = vpack.c.bf16 %v366_v15, %v365_v16 }
  0xc6   :  { %440 = vmatmul.bf16.vlgmr.msra.gmra.mxu3 %v367_v17  ;;  %536 = vmatmul.bf16.vlgmr.msrb.gmra.mxu0 %v367_v17 }
  0xc7   :  { %608 = vmatmul.bf16.vlgmr.msrb.gmra.mxu1 %v367_v17 }
 0x143   :  { %v537_v18 = vpop.f32.mrf.mxu0 }
 0x144   :  { %v609_v20 = vpop.f32.mrf.mxu1  ;;  %v546_v23 = vrot.slane %v537_v18, 1 }
 0x149   :  { %v441_v19 = vpop.f32.mrf.mxu3 }
 0x14a   :  { %v542_v25 = vrot.slane %v441_v19, 7 }
 0x14b   :  { %v539_v21 = vpop.f32.mrf.mxu0 }
 0x14c   :  { %v547_v22 = vrot.slane %v539_v21, 1  ;;  %v611_v28 = vpop.f32.mrf.mxu1 }
 0x14e   :  { %v549_v27 = vsel %vm288_vm2, %v547_v22, %v546_v23  ;;  %v548_v37 = vsel %vm288_vm2, %v546_v23, %v547_v22 }
 0x14f   :  { %v615_v35 = vsel %vm1064_vm3, %v549_v27, 0.0 }
 0x151   :  { %v443_v24 = vpop.f32.mrf.mxu3 }
 0x152   :  { %v543_v26 = vrot.slane %v443_v24, 7 }
 0x154   :  { %v544_v30 = vsel %vm283_vm0, %v542_v25, %v543_v26  ;;  %v545_v31 = vsel %vm283_vm0, %v543_v26, %v542_v25 }
 0x155   :  { %v550_v32 = vsel %vm1056_vm1, %v545_v31, 0.0  ;;  %v612_v33 = vadd.f32 %v611_v28, %v544_v30 }
 0x156   :  { %v610_v36 = vadd.f32 %v609_v20, %v550_v32 }
 0x157   :  { %v617_v38 = vadd.f32 %v615_v35, %v612_v33 }
 0x158   :  { %v616_v40 = vadd.f32 %v610_v36, %v548_v37 }
 0x159   :  { %v623_v42 = vadd.f32 %v906_v34, %v617_v38 }
 0x15a   :  { %v622_v43 = vadd.f32 %v906_v34, %v616_v40 }
 0x15b   :  { %v627_v44 = vadd.f32 %v625_v39, %v623_v42 }
 0x15c   :  { %v626_v45 = vadd.f32 %v624_v41, %v622_v43 }
 0x15d   :  { %v629_v46 = vmax.f32 %v627_v44, 0.0 }
 0x15e   :  { %v628_v47 = vmax.f32 %v626_v45, 0.0 }
 0x15f   :  { %631 = vst [vmem:[#allocation8 + $0x8] sm:$0xff] %v629_v46 }
 0x160   :  { %630 = vst [vmem:[#allocation8] sm:$0xff] %v628_v47 }
 0x161   :  { %644 = dma.vmem_to_hbm [thread:$0]  %s637_s11, 256, %s639_s14, [#allocation4], %s1015_s4, %s1015_s4, %s1016_s15  }
 0x162   :  { %1007 = dma.done.wait [#allocation4], 256  }
 0x163   :  { %1008 = vsyncadd [#allocation4], 4294967040 }
 0x164   :  { %649 = vsyncpa [#allocation3], 1 }
 0x165   :  { %650 = vsyncpa [#allocation6], 1 }
 0x166   :  { %651 = vsyncpa [#allocation4], 1 }

</bundles_post_ra>
